<compile_context>
chip_gen: v6e
topology: v6e:2x2x1
jax: 0.10.0
libtpu: 0.0.40
codegen_flags: <defaults>
</compile_context>

<pallas_src>
import functools

import jax
import jax.numpy as jnp
from jax.experimental import pallas as pl
from jax.experimental.pallas import tpu as pltpu


# ----------------------------------------------------------------------------
# Model configuration
# ----------------------------------------------------------------------------
IN_CH = 3
KSIZE = 3
STRIDE = 2
PAD = 1
STEM_CH = 32     # stem conv output channels
HEAD_CH = 64     # "backbone._fc.in_features" of the stand-in backbone
OUT_DIM = 256    # replaced _fc output dim

VMEM_LIMIT_BYTES = 48 * 1024 * 1024   # <= 64 MiB physical on v7x, fine on v5e/v6e
TILE_VMEM_BUDGET = 32 * 1024 * 1024   # what the tile chooser plans against


def _round_up(x, m):
    return ((x + m - 1) // m) * m


# ----------------------------------------------------------------------------
# Fused Pallas kernel:
#   stem 3x3/s2 conv (as 4 contiguous-tap matmuls on the s2d image) + swish
#   -> head 1x1 conv + swish -> GAP running-sum -> replaced FC at last step.
# ----------------------------------------------------------------------------
def _fused_backbone_kernel(band_ref, ws_ref, bs_ref, wh_ref, bh_ref,
                           wf_ref, bf_ref, o_ref, acc_ref, *,
                           tile_ho, w_out, h_out, inv_hw, needs_mask):
    """Grid = (batch_block [parallel], row_tile [arbitrary/reduction]).

    band_ref : (nb, tile_ho+1, Wp2, 4C) bf16  streamed s2d row band (halo +1)
    ws_ref   : (4, 4C, 32)               bf16  remapped stem weights (resident)
    bs/wh/bh/wf/bf : resident biases / weights
    o_ref    : (nb, 256) f32  output block (written at last reduction step)
    acc_ref  : (nb, 64)  f32  GAP running-sum scratch
    """
    s = pl.program_id(1)
    ns = pl.num_programs(1)

    @pl.when(s == 0)
    def _init():                                 # per batch-block re-init
        acc_ref[...] = jnp.zeros_like(acc_ref)

    nb, band_h, wp2, c4 = band_ref.shape
    stem_ch = ws_ref.shape[-1]
    m = nb * tile_ho * w_out

    # --- stem 3x3/s2 conv == sum of 4 contiguous 2x2-tap matmuls (f32 acc) ---
    stem = jnp.zeros((m, stem_ch), jnp.float32)
    for di in (0, 1):
        for dj in (0, 1):
            tap = band_ref[:, di:di + tile_ho, dj:dj + w_out, :]
            stem = stem + jnp.dot(tap.reshape(m, c4), ws_ref[2 * di + dj],
                                  preferred_element_type=jnp.float32)
    stem = stem + bs_ref[...]
    stem = stem * jax.nn.sigmoid(stem)           # swish, f32 (v5e-safe)

    # --- head 1x1 conv + swish ----------------------------------------------
    head = jnp.dot(stem.astype(jnp.bfloat16), wh_ref[...],
                   preferred_element_type=jnp.float32) + bh_ref[...]
    head = head * jax.nn.sigmoid(head)           # (m, HEAD_CH) f32

    # --- global average pool: masked running per-batch column sum ------------
    head = head.reshape(nb, tile_ho * w_out, head.shape[-1])
    if needs_mask:                               # static: only for ragged tails
        row = jax.lax.broadcasted_iota(jnp.int32, (tile_ho, w_out), 0)
        valid = (row + s * tile_ho) < h_out
        head = jnp.where(valid.reshape(1, tile_ho * w_out, 1), head, 0.0)
    acc_ref[...] += jnp.sum(head, axis=1)        # (nb, HEAD_CH)

    # --- last reduction step: finalize GAP and run the replaced _fc ----------
    @pl.when(s == ns - 1)
    def _finalize():
        pooled = acc_ref[...] * inv_hw
        o_ref[...] = jnp.dot(pooled.astype(jnp.bfloat16), wf_ref[...],
                             preferred_element_type=jnp.float32) + bf_ref[...]


# ----------------------------------------------------------------------------
# Tile / block choosers (VMEM-aware, v7x-safe budget)
# ----------------------------------------------------------------------------
def _pick_batch_block(n):
    """Largest divisor of n giving >= 2 batch blocks (lights up v7x megacore)."""
    if n < 2:
        return n
    for d in range(n // 2, 0, -1):
        if n % d == 0:
            return d
    return n


def _pick_tile_ho(h_out, w_out, wp2, c4, nb, budget_bytes):
    """Largest output-row tile whose per-step working set fits `budget_bytes`.

    Counts the pipelined bf16 band buffers and the lane-padded (128-wide)
    bf16 tap copies + f32 stem/head intermediates.
    """
    def step_bytes(t):
        band_h = t + 1
        m = nb * t * w_out
        band = nb * band_h * _round_up(wp2, 8) * 128 * 2      # one bf16 band block
        taps = 4 * _round_up(m, 8) * 128 * 2                  # bf16 tap copies
        inter = 2 * _round_up(m, 8) * 128 * 4                 # f32 stem + head
        return 3 * band + taps + inter + (2 << 20)            # bufs + headroom

    best = 1
    for t in range(1, h_out + 1):
        if step_bytes(t) <= budget_bytes:
            best = t
    return best


# ----------------------------------------------------------------------------
# pallas_call wrapper
# ----------------------------------------------------------------------------
def fused_backbone_forward(params, banded, *, nb, h_out, w_out):
    n, n_tiles, band_h, wp2, c4 = banded.shape
    tile_ho = band_h - 1
    n_bblocks = n // nb
    needs_mask = (n_tiles * tile_ho) != h_out
    inv_hw = 1.0 / float(h_out * w_out)

    # Flatten (n_tiles, band_h) so the streamed band is a plain blocked dim.
    banded_flat = banded.reshape(n, n_tiles * band_h, wp2, c4)

    kernel = functools.partial(
        _fused_backbone_kernel, tile_ho=tile_ho, w_out=w_out, h_out=h_out,
        inv_hw=inv_hw, needs_mask=needs_mask)

    out = pl.pallas_call(
        kernel,
        out_shape=jax.ShapeDtypeStruct((n_bblocks, nb, OUT_DIM), jnp.float32),
        grid_spec=pltpu.PrefetchScalarGridSpec(
            num_scalar_prefetch=0,
            grid=(n_bblocks, n_tiles),
            in_specs=[
                # streamed halo'd s2d row band (auto double-buffered)
                pl.BlockSpec((nb, band_h, wp2, c4), lambda b, s: (b, s, 0, 0)),
                # resident weights / biases (constant index maps)
                pl.BlockSpec((4, c4, STEM_CH), lambda b, s: (0, 0, 0)),
                pl.BlockSpec((1, STEM_CH), lambda b, s: (0, 0)),
                pl.BlockSpec((STEM_CH, HEAD_CH), lambda b, s: (0, 0)),
                pl.BlockSpec((1, HEAD_CH), lambda b, s: (0, 0)),
                pl.BlockSpec((HEAD_CH, OUT_DIM), lambda b, s: (0, 0)),
                pl.BlockSpec((1, OUT_DIM), lambda b, s: (0, 0)),
            ],
            out_specs=pl.BlockSpec((None, nb, OUT_DIM), lambda b, s: (b, 0, 0)),
            scratch_shapes=[pltpu.VMEM((nb, HEAD_CH), jnp.float32)],
        ),
        # Batch blocks are independent (parallel, megacore on v7x); the row
        # axis is the GAP reduction and stays innermost (arbitrary).
        compiler_params=pltpu.CompilerParams(
            dimension_semantics=("parallel", "arbitrary"),
            vmem_limit_bytes=VMEM_LIMIT_BYTES),
    )(banded_flat,
      params["w_stem_sd"], params["b_stem"],
      params["w_head"], params["b_head"],
      params["w_fc"], params["b_fc"])
    return out.reshape(n, OUT_DIM)


# ----------------------------------------------------------------------------
# Plain-JAX glue: pad + space-to-depth + halo'd row banding (pure relayout,
# ~1.06x the image bytes; no im2col blow-up in HBM anymore).
# ----------------------------------------------------------------------------
def efficientnet_selfsupr_forward(params, x_nchw):
    n, c, h, w = x_nchw.shape
    x = jnp.transpose(x_nchw, (0, 2, 3, 1)).astype(jnp.float32)     # NHWC

    # conv padding, then pad spatial dims to even for the 2x2 space-to-depth
    xp = jnp.pad(x, ((0, 0), (PAD, PAD), (PAD, PAD), (0, 0)))
    hp, wp = h + 2 * PAD, w + 2 * PAD
    hp_e, wp_e = hp + (hp % 2), wp + (wp % 2)
    xp = jnp.pad(xp, ((0, 0), (0, hp_e - hp), (0, wp_e - wp), (0, 0)))
    hp2, wp2 = hp_e // 2, wp_e // 2
    c4 = 4 * c

    # space-to-depth by 2: the 3x3/s2 conv becomes a 2x2/s1 conv over (.., 4C)
    sd = xp.reshape(n, hp2, 2, wp2, 2, c).transpose(0, 1, 3, 2, 4, 5)
    sd = sd.reshape(n, hp2, wp2, c4)

    h_out = (h + 2 * PAD - KSIZE) // STRIDE + 1
    w_out = (w + 2 * PAD - KSIZE) // STRIDE + 1

    nb = _pick_batch_block(n)
    tile_ho = _pick_tile_ho(h_out, w_out, wp2, c4, nb, TILE_VMEM_BUDGET)
    n_tiles = -(-h_out // tile_ho)
    band_h = tile_ho + 1

    rows_needed = n_tiles * tile_ho + 1
    if rows_needed > hp2:          # ragged tail: extra zero macro-rows (masked)
        sd = jnp.pad(sd, ((0, 0), (0, rows_needed - hp2), (0, 0), (0, 0)))

    if n_tiles == 1:
        banded = sd[:, :band_h][:, None]                         # (n,1,band_h,..)
    else:
        row_idx = (jnp.arange(n_tiles) * tile_ho)[:, None] + \
                  jnp.arange(band_h)[None, :]
        banded = sd[:, row_idx]                                  # (n,T,band_h,..)
    banded = banded.astype(jnp.bfloat16)

    return fused_backbone_forward(params, banded, nb=nb,
                                  h_out=h_out, w_out=w_out)      # (N, 256)


# ----------------------------------------------------------------------------
# Parameters (deterministic).  The stem weight is stored both flat (for the
# im2col reference) and remapped to the space-to-depth 2x2-tap layout used by
# the kernel:  Wsd[2*di+dj][a*2C + b*C + ch, o] = W[2*di+a, 2*dj+b, ch, o].
# ----------------------------------------------------------------------------
def init_params(key, in_ch=IN_CH):
    k1, k2, k3, k4, k5 = jax.random.split(key, 5)
    w_conv = 0.1 * jax.random.normal(k1, (KSIZE, KSIZE, in_ch, STEM_CH),
                                     jnp.float32)
    w_stem_flat = w_conv.reshape(KSIZE * KSIZE * in_ch, STEM_CH)

    wp = jnp.pad(w_conv, ((0, 1), (0, 1), (0, 0), (0, 0)))        # (4,4,C,32)
    wsd = wp.reshape(2, 2, 2, 2, in_ch, STEM_CH)                  # di,a,dj,b,C,O
    wsd = wsd.transpose(0, 2, 1, 3, 4, 5).reshape(4, 4 * in_ch, STEM_CH)

    return {
        "w_stem_flat": w_stem_flat.astype(jnp.bfloat16),
        "w_stem_sd": wsd.astype(jnp.bfloat16),
        "b_stem": 0.1 * jax.random.normal(k4, (1, STEM_CH), jnp.float32),
        "w_head": (0.1 * jax.random.normal(
            k2, (STEM_CH, HEAD_CH), jnp.float32)).astype(jnp.bfloat16),
        "b_head": 0.1 * jax.random.normal(k5, (1, HEAD_CH), jnp.float32),
        "w_fc": (0.1 * jax.random.normal(
            k3, (HEAD_CH, OUT_DIM), jnp.float32)).astype(jnp.bfloat16),
        "b_fc": jnp.zeros((1, OUT_DIM), jnp.float32),
    }


# ----------------------------------------------------------------------------
# Pure-JAX reference: classic im2col formulation with the ORIGINAL 3x3 weight
# layout (validates the space-to-depth remap), same bf16-in / f32-accum math.
# ----------------------------------------------------------------------------
def reference_forward(params, x_nchw):
    n, c, h, w = x_nchw.shape
    x = jnp.transpose(x_nchw, (0, 2, 3, 1)).astype(jnp.float32)
    xp = jnp.pad(x, ((0, 0), (PAD, PAD), (PAD, PAD), (0, 0)))
    ho = (h + 2 * PAD - KSIZE) // STRIDE + 1
    wo = (w + 2 * PAD - KSIZE) // STRIDE + 1
    cols = []
    for i in range(KSIZE):
        for j in range(KSIZE):
            cols.append(xp[:, i:i + STRIDE * ho:STRIDE,
                           j:j + STRIDE * wo:STRIDE, :])
    patches = jnp.concatenate(cols, axis=-1).reshape(n, ho * wo,
                                                     KSIZE * KSIZE * c)
    p = patches.astype(jnp.bfloat16).reshape(n * ho * wo, -1)
    stem = jnp.dot(p, params["w_stem_flat"],
                   preferred_element_type=jnp.float32) + params["b_stem"]
    stem = stem * jax.nn.sigmoid(stem)
    head = jnp.dot(stem.astype(jnp.bfloat16), params["w_head"],
                   preferred_element_type=jnp.float32) + params["b_head"]
    head = head * jax.nn.sigmoid(head)
    pooled = jnp.mean(head.reshape(n, ho * wo, HEAD_CH), axis=1)
    return jnp.dot(pooled.astype(jnp.bfloat16), params["w_fc"],
                   preferred_element_type=jnp.float32) + params["b_fc"]


# ----------------------------------------------------------------------------
if __name__ == "__main__":
    key = jax.random.PRNGKey(0)
    k_param, k_input = jax.random.split(key)

    params = init_params(k_param, in_ch=IN_CH)
    x = jax.random.normal(k_input, (2, IN_CH, 16, 16), jnp.float32)  # NCHW

    fwd = jax.jit(efficientnet_selfsupr_forward)
    y = fwd(params, x)
    jax.block_until_ready(y)

    assert y.shape == (2, OUT_DIM), y.shape
    assert y.dtype == jnp.float32

    y_ref = jax.jit(reference_forward)(params, x)
    jax.block_until_ready(y_ref)
    assert jnp.allclose(y, y_ref, atol=1e-2, rtol=1e-2), \
        float(jnp.max(jnp.abs(y - y_ref)))

    print("KERNEL_OK")
</pallas_src>

<mosaic_0001>
module attributes {stable_mosaic.version = 11 : i64} {
  func.func @_fused_backbone_kernel(%arg0: i32, %arg1: i32, %arg2: memref<1x9x9x12xbf16, #tpu.memory_space<vmem>>, %arg3: memref<4x12x32xbf16, #tpu.memory_space<vmem>>, %arg4: memref<1x32xf32, #tpu.memory_space<vmem>>, %arg5: memref<32x64xbf16, #tpu.memory_space<vmem>>, %arg6: memref<1x64xf32, #tpu.memory_space<vmem>>, %arg7: memref<64x256xbf16, #tpu.memory_space<vmem>>, %arg8: memref<1x256xf32, #tpu.memory_space<vmem>>, %arg9: memref<1x1x256xf32, #tpu.memory_space<vmem>>, %arg10: memref<1x64xf32, #tpu.memory_space<vmem>>) attributes {dimension_semantics = [#tpu.dimension_semantics<parallel>, #tpu.dimension_semantics<arbitrary>], iteration_bounds = array<i64: 2, 1>, scalar_prefetch = 0 : i64, scratch_operands = 1 : i64, tpu.core_type = #tpu.core_type<tc>, window_params = [{transform_indices = @transform_0, window_bounds = array<i64: 1, 9, 9, 12>}, {pipeline_mode = #tpu.pipeline_mode<synchronous>, transform_indices = @transform_1, window_bounds = array<i64: 4, 12, 32>}, {pipeline_mode = #tpu.pipeline_mode<synchronous>, transform_indices = @transform_2, window_bounds = array<i64: 1, 32>}, {pipeline_mode = #tpu.pipeline_mode<synchronous>, transform_indices = @transform_3, window_bounds = array<i64: 32, 64>}, {pipeline_mode = #tpu.pipeline_mode<synchronous>, transform_indices = @transform_4, window_bounds = array<i64: 1, 64>}, {pipeline_mode = #tpu.pipeline_mode<synchronous>, transform_indices = @transform_5, window_bounds = array<i64: 64, 256>}, {pipeline_mode = #tpu.pipeline_mode<synchronous>, transform_indices = @transform_6, window_bounds = array<i64: 1, 256>}, {transform_indices = @transform_7, window_bounds = array<i64: 1, 1, 256>}]} {
    %c0_i32 = arith.constant 0 : i32
    %0 = arith.cmpi eq, %arg1, %c0_i32 : i32
    %1 = arith.extui %0 : i1 to i32
    %c0_i32_0 = arith.constant 0 : i32
    %2 = arith.cmpi ne, %1, %c0_i32_0 : i32
    scf.if %2 {
      %cst_45 = arith.constant 0.000000e+00 : f32
      %57 = vector.broadcast %cst_45 : f32 to vector<1x64xf32>
      %c0_46 = arith.constant 0 : index
      %c0_47 = arith.constant 0 : index
      %58 = vector.load %arg10[%c0_46, %c0_47] : memref<1x64xf32, #tpu.memory_space<vmem>>, vector<1x64xf32>
      tpu.vector_store %arg10[%c0_46, %c0_47], %57 {strides = array<i32>} : memref<1x64xf32, #tpu.memory_space<vmem>>, vector<1x64xf32>,
    } else {
    }
    %cst = arith.constant 0.000000e+00 : f32
    %3 = vector.broadcast %cst : f32 to vector<64x32xf32>
    %c0 = arith.constant 0 : index
    %c0_1 = arith.constant 0 : index
    %c0_2 = arith.constant 0 : index
    %c0_3 = arith.constant 0 : index
    %4 = vector.load %arg2[%c0, %c0_1, %c0_2, %c0_3] : memref<1x9x9x12xbf16, #tpu.memory_space<vmem>>, vector<1x8x8x12xbf16>
    %5 = vector.shape_cast %4 : vector<1x8x8x12xbf16> to vector<64x12xbf16>
    %c0_4 = arith.constant 0 : index
    %c0_5 = arith.constant 0 : index
    %c0_6 = arith.constant 0 : index
    %6 = vector.load %arg3[%c0_4, %c0_5, %c0_6] : memref<4x12x32xbf16, #tpu.memory_space<vmem>>, vector<1x12x32xbf16>
    %7 = vector.shape_cast %6 : vector<1x12x32xbf16> to vector<12x32xbf16>
    %cst_7 = arith.constant dense<0.000000e+00> : vector<64x32xf32>
    %8 = tpu.matmul %5, %7, %cst_7 {dimension_numbers = #tpu.dot_dimension_numbers<[1], [0], [0], [1], [0, 0, 1, 1], [], []>} : vector<64x12xbf16>, vector<12x32xbf16>, vector<64x32xf32> -> vector<64x32xf32>
    %9 = arith.addf %3, %8 : vector<64x32xf32>
    %c0_8 = arith.constant 0 : index
    %c0_9 = arith.constant 0 : index
    %c1 = arith.constant 1 : index
    %c0_10 = arith.constant 0 : index
    %10 = vector.load %arg2[%c0_8, %c0_9, %c1, %c0_10] : memref<1x9x9x12xbf16, #tpu.memory_space<vmem>>, vector<1x8x8x12xbf16>
    %11 = vector.shape_cast %10 : vector<1x8x8x12xbf16> to vector<64x12xbf16>
    %c1_11 = arith.constant 1 : index
    %c0_12 = arith.constant 0 : index
    %c0_13 = arith.constant 0 : index
    %12 = vector.load %arg3[%c1_11, %c0_12, %c0_13] : memref<4x12x32xbf16, #tpu.memory_space<vmem>>, vector<1x12x32xbf16>
    %13 = vector.shape_cast %12 : vector<1x12x32xbf16> to vector<12x32xbf16>
    %cst_14 = arith.constant dense<0.000000e+00> : vector<64x32xf32>
    %14 = tpu.matmul %11, %13, %cst_14 {dimension_numbers = #tpu.dot_dimension_numbers<[1], [0], [0], [1], [0, 0, 1, 1], [], []>} : vector<64x12xbf16>, vector<12x32xbf16>, vector<64x32xf32> -> vector<64x32xf32>
    %15 = arith.addf %9, %14 : vector<64x32xf32>
    %c0_15 = arith.constant 0 : index
    %c1_16 = arith.constant 1 : index
    %c0_17 = arith.constant 0 : index
    %c0_18 = arith.constant 0 : index
    %16 = vector.load %arg2[%c0_15, %c1_16, %c0_17, %c0_18] : memref<1x9x9x12xbf16, #tpu.memory_space<vmem>>, vector<1x8x8x12xbf16>
    %17 = vector.shape_cast %16 : vector<1x8x8x12xbf16> to vector<64x12xbf16>
    %c2 = arith.constant 2 : index
    %c0_19 = arith.constant 0 : index
    %c0_20 = arith.constant 0 : index
    %18 = vector.load %arg3[%c2, %c0_19, %c0_20] : memref<4x12x32xbf16, #tpu.memory_space<vmem>>, vector<1x12x32xbf16>
    %19 = vector.shape_cast %18 : vector<1x12x32xbf16> to vector<12x32xbf16>
    %cst_21 = arith.constant dense<0.000000e+00> : vector<64x32xf32>
    %20 = tpu.matmul %17, %19, %cst_21 {dimension_numbers = #tpu.dot_dimension_numbers<[1], [0], [0], [1], [0, 0, 1, 1], [], []>} : vector<64x12xbf16>, vector<12x32xbf16>, vector<64x32xf32> -> vector<64x32xf32>
    %21 = arith.addf %15, %20 : vector<64x32xf32>
    %c0_22 = arith.constant 0 : index
    %c1_23 = arith.constant 1 : index
    %c1_24 = arith.constant 1 : index
    %c0_25 = arith.constant 0 : index
    %22 = vector.load %arg2[%c0_22, %c1_23, %c1_24, %c0_25] : memref<1x9x9x12xbf16, #tpu.memory_space<vmem>>, vector<1x8x8x12xbf16>
    %23 = vector.shape_cast %22 : vector<1x8x8x12xbf16> to vector<64x12xbf16>
    %c3 = arith.constant 3 : index
    %c0_26 = arith.constant 0 : index
    %c0_27 = arith.constant 0 : index
    %24 = vector.load %arg3[%c3, %c0_26, %c0_27] : memref<4x12x32xbf16, #tpu.memory_space<vmem>>, vector<1x12x32xbf16>
    %25 = vector.shape_cast %24 : vector<1x12x32xbf16> to vector<12x32xbf16>
    %cst_28 = arith.constant dense<0.000000e+00> : vector<64x32xf32>
    %26 = tpu.matmul %23, %25, %cst_28 {dimension_numbers = #tpu.dot_dimension_numbers<[1], [0], [0], [1], [0, 0, 1, 1], [], []>} : vector<64x12xbf16>, vector<12x32xbf16>, vector<64x32xf32> -> vector<64x32xf32>
    %27 = arith.addf %21, %26 : vector<64x32xf32>
    %c0_29 = arith.constant 0 : index
    %c0_30 = arith.constant 0 : index
    %28 = vector.load %arg4[%c0_29, %c0_30] : memref<1x32xf32, #tpu.memory_space<vmem>>, vector<1x32xf32>
    %29 = vector.broadcast %28 : vector<1x32xf32> to vector<64x32xf32>
    %30 = arith.addf %27, %29 : vector<64x32xf32>
    %31 = arith.negf %30 : vector<64x32xf32>
    %32 = math.exp %31 : vector<64x32xf32>
    %cst_31 = arith.constant 1.000000e+00 : f32
    %33 = vector.broadcast %cst_31 : f32 to vector<64x32xf32>
    %34 = arith.addf %33, %32 : vector<64x32xf32>
    %35 = arith.divf %33, %34 : vector<64x32xf32>
    %36 = arith.mulf %30, %35 : vector<64x32xf32>
    %37 = arith.truncf %36 : vector<64x32xf32> to vector<64x32xbf16>
    %c0_32 = arith.constant 0 : index
    %c0_33 = arith.constant 0 : index
    %38 = vector.load %arg5[%c0_32, %c0_33] : memref<32x64xbf16, #tpu.memory_space<vmem>>, vector<32x64xbf16>
    %cst_34 = arith.constant dense<0.000000e+00> : vector<64x64xf32>
    %39 = tpu.matmul %37, %38, %cst_34 {dimension_numbers = #tpu.dot_dimension_numbers<[1], [0], [0], [1], [0, 0, 1, 1], [], []>} : vector<64x32xbf16>, vector<32x64xbf16>, vector<64x64xf32> -> vector<64x64xf32>
    %c0_35 = arith.constant 0 : index
    %c0_36 = arith.constant 0 : index
    %40 = vector.load %arg6[%c0_35, %c0_36] : memref<1x64xf32, #tpu.memory_space<vmem>>, vector<1x64xf32>
    %41 = vector.broadcast %40 : vector<1x64xf32> to vector<64x64xf32>
    %42 = arith.addf %39, %41 : vector<64x64xf32>
    %43 = arith.negf %42 : vector<64x64xf32>
    %44 = math.exp %43 : vector<64x64xf32>
    %cst_37 = arith.constant 1.000000e+00 : f32
    %45 = vector.broadcast %cst_37 : f32 to vector<64x64xf32>
    %46 = arith.addf %45, %44 : vector<64x64xf32>
    %47 = arith.divf %45, %46 : vector<64x64xf32>
    %48 = arith.mulf %42, %47 : vector<64x64xf32>
    %49 = vector.shape_cast %48 : vector<64x64xf32> to vector<1x64x64xf32>
    %c0_38 = arith.constant 0 : index
    %c0_39 = arith.constant 0 : index
    %50 = vector.load %arg10[%c0_38, %c0_39] : memref<1x64xf32, #tpu.memory_space<vmem>>, vector<1x64xf32>
    %cst_40 = arith.constant dense<0.000000e+00> : vector<1x64xf32>
    %51 = vector.multi_reduction <add>, %49, %cst_40 [1] : vector<1x64x64xf32> to vector<1x64xf32>
    %52 = arith.addf %50, %51 : vector<1x64xf32>
    %c0_41 = arith.constant 0 : index
    %c0_42 = arith.constant 0 : index
    %53 = vector.load %arg10[%c0_41, %c0_42] : memref<1x64xf32, #tpu.memory_space<vmem>>, vector<1x64xf32>
    tpu.vector_store %arg10[%c0_41, %c0_42], %52 {strides = array<i32>} : memref<1x64xf32, #tpu.memory_space<vmem>>, vector<1x64xf32>,
    %c0_i32_43 = arith.constant 0 : i32
    %54 = arith.cmpi eq, %arg1, %c0_i32_43 : i32
    %55 = arith.extui %54 : i1 to i32
    %c0_i32_44 = arith.constant 0 : i32
    %56 = arith.cmpi ne, %55, %c0_i32_44 : i32
    scf.if %56 {
      %c0_45 = arith.constant 0 : index
      %c0_46 = arith.constant 0 : index
      %57 = vector.load %arg10[%c0_45, %c0_46] : memref<1x64xf32, #tpu.memory_space<vmem>>, vector<1x64xf32>
      %cst_47 = arith.constant 1.562500e-02 : f32
      %58 = vector.broadcast %cst_47 : f32 to vector<1x64xf32>
      %59 = arith.mulf %57, %58 : vector<1x64xf32>
      %60 = arith.truncf %59 : vector<1x64xf32> to vector<1x64xbf16>
      %c0_48 = arith.constant 0 : index
      %c0_49 = arith.constant 0 : index
      %61 = vector.load %arg7[%c0_48, %c0_49] : memref<64x256xbf16, #tpu.memory_space<vmem>>, vector<64x256xbf16>
      %cst_50 = arith.constant dense<0.000000e+00> : vector<1x256xf32>
      %62 = tpu.matmul %60, %61, %cst_50 {dimension_numbers = #tpu.dot_dimension_numbers<[1], [0], [0], [1], [0, 0, 1, 1], [], []>} : vector<1x64xbf16>, vector<64x256xbf16>, vector<1x256xf32> -> vector<1x256xf32>
      %c0_51 = arith.constant 0 : index
      %c0_52 = arith.constant 0 : index
      %63 = vector.load %arg8[%c0_51, %c0_52] : memref<1x256xf32, #tpu.memory_space<vmem>>, vector<1x256xf32>
      %64 = arith.addf %62, %63 : vector<1x256xf32>
      %c0_53 = arith.constant 0 : index
      %c0_54 = arith.constant 0 : index
      %c0_55 = arith.constant 0 : index
      %65 = vector.load %arg9[%c0_53, %c0_54, %c0_55] : memref<1x1x256xf32, #tpu.memory_space<vmem>>, vector<1x1x256xf32>
      %66 = vector.shape_cast %65 : vector<1x1x256xf32> to vector<1x256xf32>
      %67 = vector.shape_cast %64 : vector<1x256xf32> to vector<1x1x256xf32>
      tpu.vector_store %arg9[%c0_53, %c0_54, %c0_55], %67 {strides = array<i32>} : memref<1x1x256xf32, #tpu.memory_space<vmem>>, vector<1x1x256xf32>,
    } else {
    }
    return
  }
  func.func @transform_0(%arg0: i32, %arg1: i32) -> (i32, i32, i32, i32) {
    %c0_i32 = arith.constant 0 : i32
    %c0_i32_0 = arith.constant 0 : i32
    %c0_i32_1 = arith.constant 0 : i32
    return %arg0, %arg1, %c0_i32, %c0_i32_0 : i32, i32, i32, i32
  }
  func.func @transform_1(%arg0: i32, %arg1: i32) -> (i32, i32, i32) {
    %c0_i32 = arith.constant 0 : i32
    %c0_i32_0 = arith.constant 0 : i32
    %c0_i32_1 = arith.constant 0 : i32
    %c0_i32_2 = arith.constant 0 : i32
    return %c0_i32, %c0_i32_0, %c0_i32_1 : i32, i32, i32
  }
  func.func @transform_2(%arg0: i32, %arg1: i32) -> (i32, i32) {
    %c0_i32 = arith.constant 0 : i32
    %c0_i32_0 = arith.constant 0 : i32
    %c0_i32_1 = arith.constant 0 : i32
    return %c0_i32, %c0_i32_0 : i32, i32
  }
  func.func @transform_3(%arg0: i32, %arg1: i32) -> (i32, i32) {
    %c0_i32 = arith.constant 0 : i32
    %c0_i32_0 = arith.constant 0 : i32
    %c0_i32_1 = arith.constant 0 : i32
    return %c0_i32, %c0_i32_0 : i32, i32
  }
  func.func @transform_4(%arg0: i32, %arg1: i32) -> (i32, i32) {
    %c0_i32 = arith.constant 0 : i32
    %c0_i32_0 = arith.constant 0 : i32
    %c0_i32_1 = arith.constant 0 : i32
    return %c0_i32, %c0_i32_0 : i32, i32
  }
  func.func @transform_5(%arg0: i32, %arg1: i32) -> (i32, i32) {
    %c0_i32 = arith.constant 0 : i32
    %c0_i32_0 = arith.constant 0 : i32
    %c0_i32_1 = arith.constant 0 : i32
    return %c0_i32, %c0_i32_0 : i32, i32
  }
  func.func @transform_6(%arg0: i32, %arg1: i32) -> (i32, i32) {
    %c0_i32 = arith.constant 0 : i32
    %c0_i32_0 = arith.constant 0 : i32
    %c0_i32_1 = arith.constant 0 : i32
    return %c0_i32, %c0_i32_0 : i32, i32
  }
  func.func @transform_7(%arg0: i32, %arg1: i32) -> (i32, i32, i32) {
    %c0_i32 = arith.constant 0 : i32
    %c0_i32_0 = arith.constant 0 : i32
    %c0_i32_1 = arith.constant 0 : i32
    return %arg0, %c0_i32, %c0_i32_0 : i32, i32, i32
  }
}

</mosaic_0001>

<bundles_post_ra>
// kernel: efficientnet_selfsupr_forward.1
= control target key start
LH: loop header
LB: loop body
LE: loop exit
PB: predicated region body
PF: predicated region fallthrough
CT: control target
= control target key end

     0   :  { %s1852_s24 = smov 0   ;;  %s1854_s25 = smov 0   ;;  %s2070_s0 = inlined_call_operand.vmem [shape: bf16[2,9,9,12], index: 0, kind: input, shape index: {}]   ;;  %s2071_s1 = inlined_call_operand.vmem [shape: bf16[4,12,32], index: 1, kind: input, shape index: {}]   ;;  %s2072_s2 = inlined_call_operand.vmem [shape: f32[1,32], index: 2, kind: input, shape index: {}]   ;;  %s2073_s3 = inlined_call_operand.vmem [shape: bf16[32,64], index: 3, kind: input, shape index: {}]   ;;  %s2074_s4 = inlined_call_operand.vmem [shape: f32[1,64], index: 4, kind: input, shape index: {}]   ;;  %s2075_s5 = inlined_call_operand.vmem [shape: bf16[64,256], index: 5, kind: input, shape index: {}]   ;;  %s2076_s6 = inlined_call_operand.vmem [shape: f32[1,256], index: 6, kind: input, shape index: {}]   ;;  %s2077_s7 = inlined_call_operand.vmem [shape: f32[2,1,256], index: 7, kind: output, shape index: {}]  }
   0x1   :  { %s1856_s26 = smov 0  }
   0x2 LB: > { %s29_s27 = sadd.s32 1, %s1803_s25  ;;  %p1481_p0 = scmp.ge.s32.totalorder %s1807_s26, 1  ;;  %s1807_s26 = sphi %s1856_s26, %s17_s26   ;;  %s1803_s25 = sphi %s1854_s25, %s2081_s25   ;;  %s1799_s24 = sphi %s1852_s24, %s2080_s24  }
   0x3   : > { %p31_p1 = scmp.ge.s32.totalorder %s29_s27, 2  ;;  %p257_p2 = scmp.lt.s32.totalorder %s1807_s26, 3 }
   0x5   : > { %s2083_s27 = smov (%p31_p1, %s29_s27), 0  ;;  %p258_p3 = pnand %p1481_p0, %p257_p2 }
   0x6   : > { %p294_p4 = scmp.lt.s32.totalorder (!%p258_p3), %s1799_s24, 1 }
   0x7   : > { %261 = sbr.rel (%p258_p3) target bundleno = 776 (0x308), region = 48 }
   0xc   : > { %vm481_vm0 = vcmask 1045504   ;;  %v1695_v0 = vld [vmem:[%s2071_s1] sm:$0x3f]   ;;  %v1696_v1 = vld [vmem:[%s2071_s1 + $0x8] sm:$0x3f]   ;;  %s2085_s24 = smov (!%p294_p4, %s1799_s24), 1 }
   0xd   : > { %vm468_vm1 = vcmask 97280   ;;  %vm333_vm2 = vsmask.f32 3328  ;;  %1664 = vmatprep.subr.msk.bf16.mxu1 %vm481_vm0, %v1695_v0  ;;  %v588_v2 = vsel %vm481_vm0, %v1695_v0, 0  ;;  %vm334_vm3 = vsmask.f32 7440  ;;  %1663 = vmatprep.subr.msk.bf16.mxu0 %vm481_vm0, %v1696_v1 }
   0xe   : > { %1622 = vmatpush3.bf16.msra.mxu1 %v588_v2  ;;  %s1667_s9 = smul.u32 72, %s2085_s24  ;;  %v483_v3 = vsel %vm481_vm0, %v1696_v1, 0  ;;  %v1699_v4 = vld [vmem:[%s2071_s1 + $0x10] sm:$0x3f]   ;;  %v1700_v5 = vld [vmem:[%s2071_s1 + $0x18] sm:$0x3f]   ;;  %vm1910_vm4 = vmor %vm333_vm2, %vm334_vm3 }
   0xf   : > { %1612 = vmatpush3.bf16.msra.mxu0 %v483_v3  ;;  %v1896_v6 = vsel %vm481_vm0, %v1699_v4, 0  ;;  %1666 = vmatprep.subr.msk.bf16.mxu1 %vm481_vm0, %v1700_v5  ;;  %v941_v52 = vsel %vm481_vm0, %v1700_v5, 0  ;;  %vm1114_vm5 = vcmask 261120   ;;  %vm313_vm6 = vcmask 516096   ;;  %s1483_s28 = sshll.u32 %s2085_s24, 1 }
  0x10   : > { %s1892_s16 = scalar_lea.vmem %s2070_s0, %s1667_s9  ;;  %1665 = vmatprep.subr.msk.bf16.mxu0 %vm481_vm0, %v1699_v4  ;;  %vm1249_vm7 = vcmask 523264   ;;  %s307_s8 = scalar_lea.vmem %s2077_s7, %s1483_s28 }
  0x11   : > { %v315_v7 = vld [vmem:[%s1892_s16] sm:$0xf]  ;;  %v316_v8 = vld [vmem:[%s1892_s16 + $0x8] sm:$0xf]  ;;  %v317_v9 = vld [vmem:[%s1892_s16 + $0x10] sm:$0xf] }
  0x12   : > { %v337_v10 = vshrl.u32 %v315_v7, 16  ;;  %v340_v11 = vshll.u32 %v315_v7, 16  ;;  %v351_v12 = vshrl.u32 %v316_v8, 16  ;;  %v354_v13 = vshll.u32 %v316_v8, 16  ;;  %v318_v14 = vld [vmem:[%s1892_s16 + $0x18] sm:$0xf] }
  0x13   : > { %v1495_v15 = vcombine.low %v315_v7, %v316_v8  ;;  %v365_v16 = vshrl.u32 %v317_v9, 16  ;;  %v368_v17 = vshll.u32 %v317_v9, 16  ;;  %v379_v18 = vshrl.u32 %v318_v14, 16  ;;  %v325_v19 = vld [vmem:[%s1892_s16 + $0x4] sm:$0x1] }
  0x14   : > { %v339_v20 = vrot.slane %v337_v10, 4  ;;  %v342_v21 = vrot.slane %v340_v11, 5  ;;  %v353_v22 = vrot.slane %v351_v12, 4  ;;  %v356_v23 = vrot.slane %v354_v13, 5  ;;  %v326_v24 = vld [vmem:[%s1892_s16 + $0xc] sm:$0x1] }
  0x15   : > { %1623 = vmatprep.mubr.msk.bf16.mxu1 %vm468_vm1, %v1495_v15  ;;  %v367_v25 = vrot.slane %v365_v16, 4  ;;  %v370_v26 = vrot.slane %v368_v17, 5  ;;  %v381_v27 = vrot.slane %v379_v18, 4  ;;  %v382_v28 = vshll.u32 %v318_v14, 16  ;;  %v327_v29 = vld [vmem:[%s1892_s16 + $0x14] sm:$0x1] }
  0x16   : > { %v1496_v30 = vcombine.low %v317_v9, %v318_v14  ;;  %v343_v31 = vor.u32 %v342_v21, %v339_v20  ;;  %v346_v32 = vshll.u32 %v325_v19, 16  ;;  %v357_v33 = vor.u32 %v356_v23, %v353_v22  ;;  %v328_v34 = vld [vmem:[%s1892_s16 + $0x1c] sm:$0x1]  ;;  %v319_v40 = vld [vmem:[%s1892_s16 + $0x20] sm:$0xf] }
  0x17   : > { %v384_v35 = vrot.slane %v382_v28, 5  ;;  %v360_v37 = vshll.u32 %v326_v24, 16  ;;  %v371_v38 = vor.u32 %v370_v26, %v367_v25  ;;  %v374_v39 = vshll.u32 %v327_v29, 16  ;;  %v320_v49 = vld [vmem:[%s1892_s16 + $0x28] sm:$0xf] }
  0x18   : > { %1624 = vmatmul.mubr.msk.bf16.vlgmr.msra.gmra.mxu1 %vm468_vm1, %v1496_v30  ;;  %v344_v41 = vrot.slane %v343_v31, 4  ;;  %v348_v42 = vrot.slane %v346_v32, 5  ;;  %v358_v43 = vrot.slane %v357_v33, 4  ;;  %v388_v44 = vshll.u32 %v328_v34, 16  ;;  %v321_v54 = vld [vmem:[%s1892_s16 + $0x30] sm:$0xf] }
  0x19   : > { %v362_v45 = vrot.slane %v360_v37, 5  ;;  %v372_v46 = vrot.slane %v371_v38, 4  ;;  %v376_v47 = vrot.slane %v374_v39, 5  ;;  %v385_v48 = vor.u32 %v384_v35, %v381_v27  ;;  %1642 = vmatpush3.bf16.msra.mxu1 %v941_v52  ;;  %v322_v63 = vld [vmem:[%s1892_s16 + $0x38] sm:$0xf] }
  0x1a   : > { %v349_v50 = vsel %vm1910_vm4, %v344_v41, %v348_v42  ;;  %v390_v51 = vrot.slane %v388_v44, 5  ;;  %v393_v53 = vshrl.u32 %v319_v40, 16  ;;  %v396_v58 = vshll.u32 %v319_v40, 16  ;;  %v329_v4 = vld [vmem:[%s1892_s16 + $0x24] sm:$0x1] }
  0x1b   : > { %v363_v55 = vsel %vm1910_vm4, %v358_v43, %v362_v45  ;;  %v377_v56 = vsel %vm1910_vm4, %v372_v46, %v376_v47  ;;  %v386_v57 = vrot.slane %v385_v48, 4  ;;  %v407_v61 = vshrl.u32 %v320_v49, 16  ;;  %v330_v5 = vld [vmem:[%s1892_s16 + $0x2c] sm:$0x1]  ;;  %v331_v11 = vld [vmem:[%s1892_s16 + $0x34] sm:$0x1] }
  0x1c   : > { %v1486_v59 = vcombine.low %v349_v50, %v363_v55  ;;  %v395_v60 = vrot.slane %v393_v53, 4  ;;  %v410_v62 = vshll.u32 %v320_v49, 16  ;;  %v398_v1 = vrot.slane %v396_v58, 5  ;;  %v332_v20 = vld [vmem:[%s1892_s16 + $0x3c] sm:$0x1] }
  0x1d   : > { %v391_v0 = vsel %vm1910_vm4, %v386_v57, %v390_v51  ;;  %v1497_v2 = vcombine.low %v319_v40, %v320_v49  ;;  %v421_v3 = vshrl.u32 %v321_v54, 16  ;;  %v409_v8 = vrot.slane %v407_v61, 4  ;;  %v1523_v21 = vld [vmem:[%s1892_s16 + $0x8] sm:$0xf]  ;;  %v1524_v26 = vld [vmem:[%s1892_s16 + $0xc] sm:$0x1] }
  0x1e   : > { %1613 = vmatprep.mubr.msk.bf16.mxu0 %vm468_vm1, %v1486_v59  ;;  %v1487_v7 = vcombine.low %v377_v56, %v391_v0  ;;  %v412_v9 = vrot.slane %v410_v62, 5  ;;  %v424_v10 = vshll.u32 %v321_v54, 16  ;;  %v435_v13 = vshrl.u32 %v322_v63, 16  ;;  %v1525_v31 = vld [vmem:[%s1892_s16 + $0x10] sm:$0xf] }
  0x1f   : > { %1627 = vmatprep.mubr.msk.bf16.mxu1 %vm468_vm1, %v1497_v2  ;;  %v423_v12 = vrot.slane %v421_v3, 4  ;;  %v438_v14 = vshll.u32 %v322_v63, 16  ;;  %v1498_v15 = vcombine.low %v321_v54, %v322_v63  ;;  %v399_v17 = vor.u32 %v398_v1, %v395_v60  ;;  %v1526_v35 = vld [vmem:[%s1892_s16 + $0x14] sm:$0x1]  ;;  %v1527_v37 = vld [vmem:[%s1892_s16 + $0x18] sm:$0xf] }
  0x20   : > { %1614 = vmatmul.mubr.msk.bf16.vlgmr.msra.gmra.mxu0 %vm468_vm1, %v1487_v7  ;;  %v426_v16 = vrot.slane %v424_v10, 5  ;;  %v402_v18 = vshll.u32 %v329_v4, 16  ;;  %v413_v19 = vor.u32 %v412_v9, %v409_v8  ;;  %v437_v22 = vrot.slane %v435_v13, 4  ;;  %v1528_v42 = vld [vmem:[%s1892_s16 + $0x1c] sm:$0x1] }
  0x21   : > { %1632 = vmatpush3.bf16.msra.mxu0 %v1896_v6  ;;  %v440_v23 = vrot.slane %v438_v14, 5  ;;  %1628 = vmatmul.mubr.msk.bf16.gmra.mxu1 %vm468_vm1, %v1498_v15  ;;  %v416_v24 = vshll.u32 %v330_v5, 16  ;;  %v430_v25 = vshll.u32 %v331_v11, 16  ;;  %v400_v27 = vrot.slane %v399_v17, 4  ;;  %v1529_v47 = vld [vmem:[%s1892_s16 + $0x20] sm:$0xf] }
  0x22   : > { %v404_v28 = vrot.slane %v402_v18, 5  ;;  %v414_v29 = vrot.slane %v413_v19, 4  ;;  %v427_v30 = vor.u32 %v426_v16, %v423_v12  ;;  %v444_v6 = vshll.u32 %v332_v20, 16  ;;  %v1703_v56 = vld [vmem:[%s1892_s16 + $0x8] ss:$8 sps:$4 sm:$0xff]  }
  0x23   : > { %v418_v32 = vrot.slane %v416_v24, 5  ;;  %v432_v33 = vrot.slane %v430_v25, 5  ;;  %v441_v34 = vor.u32 %v440_v23, %v437_v22  ;;  %v797_v40 = vshrl.u32 %v1523_v21, 16  ;;  %v1530_v60 = vld [vmem:[%s1892_s16 + $0x24] sm:$0x1] }
  0x24   : > { %v405_v38 = vsel %vm1910_vm4, %v400_v27, %v404_v28  ;;  %v428_v39 = vrot.slane %v427_v30, 4  ;;  %v800_v41 = vshll.u32 %v1523_v21, 16  ;;  %v446_v45 = vrot.slane %v444_v6, 5  ;;  %v1531_v2 = vld [vmem:[%s1892_s16 + $0x28] sm:$0xf] }
  0x25   : > { %v419_v43 = vsel %vm1910_vm4, %v414_v29, %v418_v32  ;;  %v442_v44 = vrot.slane %v441_v34, 4  ;;  %v806_v46 = vshll.u32 %v1524_v26, 16  ;;  %v799_v50 = vrot.slane %v797_v40, 4  ;;  %v1532_v8 = vld [vmem:[%s1892_s16 + $0x2c] sm:$0x1] }
  0x26   : > { %v1488_v48 = vcombine.low %v405_v38, %v419_v43  ;;  %v433_v49 = vsel %vm1910_vm4, %v428_v39, %v432_v33  ;;  %v802_v51 = vrot.slane %v800_v41, 5  ;;  %v811_v54 = vshrl.u32 %v1525_v31, 16  ;;  %v1533_v13 = vld [vmem:[%s1892_s16 + $0x30] sm:$0xf]  ;;  %v1704_v17 = vld [vmem:[%s1892_s16 + $0x18] ss:$8 sps:$4 sm:$0xff]  }
  0x27   : > { %v447_v52 = vsel %vm1910_vm4, %v442_v44, %v446_v45  ;;  %v808_v53 = vrot.slane %v806_v46, 5  ;;  %v814_v55 = vshll.u32 %v1525_v31, 16  ;;  %v820_v59 = vshll.u32 %v1526_v35, 16  ;;  %v1534_v18 = vld [vmem:[%s1892_s16 + $0x34] sm:$0x1] }
  0x28   : > { %1617 = vmatprep.mubr.msk.bf16.mxu0 %vm468_vm1, %v1488_v48  ;;  %v1489_v57 = vcombine.low %v433_v49, %v447_v52  ;;  %v803_v58 = vor.u32 %v802_v51, %v799_v50  ;;  %v825_v61 = vshrl.u32 %v1527_v37, 16  ;;  %v813_v62 = vrot.slane %v811_v54, 4  ;;  %v1535_v24 = vld [vmem:[%s1892_s16 + $0x38] sm:$0xf]  ;;  %v1536_v25 = vld [vmem:[%s1892_s16 + $0x3c] sm:$0x1] }
  0x29   : > { %v816_v63 = vrot.slane %v814_v55, 5  ;;  %v828_v0 = vshll.u32 %v1527_v37, 16  ;;  %v834_v1 = vshll.u32 %v1528_v42, 16  ;;  %v822_v4 = vrot.slane %v820_v59, 5  ;;  %v1537_v30 = vld [vmem:[%s1892_s16 + $0x40] sm:$0xf] }
  0x2a   : > { %1618 = vmatmul.mubr.msk.bf16.gmra.mxu0 %vm468_vm1, %v1489_v57  ;;  %v804_v3 = vrot.slane %v803_v58, 4  ;;  %v827_v5 = vrot.slane %v825_v61, 4  ;;  %v839_v7 = vshrl.u32 %v1529_v47, 16  ;;  %v842_v12 = vshll.u32 %v1529_v47, 16  ;;  %v1705_v39 = vld [vmem:[%s1892_s16 + $0x28] ss:$8 sps:$4 sm:$0xff]  }
  0x2b   : > { %v817_v9 = vor.u32 %v816_v63, %v813_v62  ;;  %v830_v10 = vrot.slane %v828_v0, 5  ;;  %v836_v11 = vrot.slane %v834_v1, 5  ;;  %1633 = vmatprep.mubr.msk.bf16.mxu0 %vm468_vm1, %v1703_v56  ;;  %v848_v16 = vshll.u32 %v1530_v60, 16  ;;  %v1538_v45 = vld [vmem:[%s1892_s16 + $0x44] sm:$0x1] }
  0x2c   : > { %v809_v14 = vsel %vm1910_vm4, %v804_v3, %v808_v53  ;;  %v841_v15 = vrot.slane %v839_v7, 4  ;;  %v853_v19 = vshrl.u32 %v1531_v2, 16  ;;  %v844_v22 = vrot.slane %v842_v12, 5  ;;  %v1706_v63 = vld [vmem:[%s1892_s16 + $0x38] ss:$8 sps:$4 sm:$0xff]   ;;  %v1707_v12 = vld [vmem:[%s2073_s3 + $0x8] sm:$0xff]  }
  0x2d   : > { %v818_v20 = vrot.slane %v817_v9, 4  ;;  %v831_v21 = vor.u32 %v830_v10, %v827_v5  ;;  %v856_v23 = vshll.u32 %v1531_v2, 16  ;;  %v850_v26 = vrot.slane %v848_v16, 5  ;;  %1651 = vmatprep.subr.bf16.mxu0 %v1707_v12 }
  0x2e   : > { %v855_v27 = vrot.slane %v853_v19, 4  ;;  %v862_v28 = vshll.u32 %v1532_v8, 16  ;;  %v867_v29 = vshrl.u32 %v1533_v13, 16  ;;  %v845_v33 = vor.u32 %v844_v22, %v841_v15 }
  0x2f   : > { %v823_v31 = vsel %vm1910_vm4, %v818_v20, %v822_v4  ;;  %v832_v32 = vrot.slane %v831_v21, 4  ;;  %v858_v34 = vrot.slane %v856_v23, 5  ;;  %v870_v38 = vshll.u32 %v1533_v13, 16  ;;  %v1708_v13 = vld [vmem:[%s2073_s3] sm:$0xff]  }
  0x30   : > { %v1541_v6 = vcombine.low %v809_v14, %v823_v31  ;;  %v864_v35 = vrot.slane %v862_v28, 5  ;;  %v869_v37 = vrot.slane %v867_v29, 4  ;;  %v846_v41 = vrot.slane %v845_v33, 4 }
  0x31   : > { %v837_v40 = vsel %vm1910_vm4, %v832_v32, %v836_v11  ;;  %v859_v42 = vor.u32 %v858_v34, %v855_v27  ;;  %v876_v43 = vshll.u32 %v1534_v18, 16  ;;  %v872_v44 = vrot.slane %v870_v38, 5 }
  0x32   : > { %1643 = vmatprep.mubr.msk.bf16.mxu1 %vm468_vm1, %v1541_v6  ;;  %1634 = vmatmul.mubr.msk.bf16.vlgmr.msra.gmra.mxu0 %vm468_vm1, %v1704_v17  ;;  %v881_v46 = vshrl.u32 %v1535_v24, 16  ;;  %v884_v47 = vshll.u32 %v1535_v24, 16  ;;  %v890_v48 = vshll.u32 %v1536_v25, 16  ;;  %v851_v49 = vsel %vm1910_vm4, %v846_v41, %v850_v26 }
  0x33   : > { %v860_v50 = vrot.slane %v859_v42, 4  ;;  %v878_v51 = vrot.slane %v876_v43, 5  ;;  %v895_v52 = vshrl.u32 %v1537_v30, 16  ;;  %1637 = vmatprep.mubr.msk.bf16.mxu0 %vm468_vm1, %v1705_v39  ;;  %v1542_v53 = vcombine.low %v837_v40, %v851_v49  ;;  %1652 = vmatpush3.bf16.msra.mxu0 %v1707_v12 }
  0x34   : > { %v873_v54 = vor.u32 %v872_v44, %v869_v37  ;;  %v883_v55 = vrot.slane %v881_v46, 4  ;;  %v886_v56 = vrot.slane %v884_v47, 5  ;;  %v898_v58 = vshll.u32 %v1537_v30, 16  ;;  %1653 = vmatprep.subr.bf16.mxu0 %v1708_v13  ;;  %v1550_v37 = vld [vmem:[%s2072_s2] ss:$0 sm:$0xff] }
  0x35   : > { %v897_v57 = vrot.slane %v895_v52, 4  ;;  %1644 = vmatmul.mubr.msk.bf16.vlgmr.msra.gmra.mxu1 %vm468_vm1, %v1542_v53  ;;  %v865_v59 = vsel %vm1910_vm4, %v860_v50, %v864_v35  ;;  %v904_v62 = vshll.u32 %v1538_v45, 16  ;;  %v892_v0 = vrot.slane %v890_v48, 5 }
  0x36   : > { %v874_v60 = vrot.slane %v873_v54, 4  ;;  %v887_v61 = vor.u32 %v886_v56, %v883_v55  ;;  %v900_v1 = vrot.slane %v898_v58, 5 }
  0x37   : > { %v906_v7 = vrot.slane %v904_v62, 5  ;;  %1654 = vmatpush3.bf16.msra.mxu0 %v1708_v13 }
  0x38   : > { %v879_v2 = vsel %vm1910_vm4, %v874_v60, %v878_v51  ;;  %v888_v3 = vrot.slane %v887_v61, 4  ;;  %v901_v5 = vor.u32 %v900_v1, %v897_v57 }
  0x39   : > { %v1543_v4 = vcombine.low %v865_v59, %v879_v2 }
  0x3a   : > { %1638 = vmatmul.mubr.msk.bf16.gmra.mxu0 %vm468_vm1, %v1706_v63  ;;  %v893_v8 = vsel %vm1910_vm4, %v888_v3, %v892_v0  ;;  %v902_v9 = vrot.slane %v901_v5, 4 }
  0x3b   : > { %1647 = vmatprep.mubr.msk.bf16.mxu1 %vm468_vm1, %v1543_v4 }
  0x3c   : > { %v907_v10 = vsel %vm1910_vm4, %v902_v9, %v906_v7 }
  0x3d   : > { %v1544_v11 = vcombine.low %v893_v8, %v907_v10 }
  0x3f   : > { %1648 = vmatmul.mubr.msk.bf16.gmra.mxu1 %vm468_vm1, %v1544_v11 }
  0xd8   : > { %v1625_v14 = vpop.f32.mrf.mxu1 }
  0xda   : > { %v624_v15 = vpop.f32.mrf.mxu1 }
  0xdc   : > { %v1626_v16 = vpop.f32.mrf.mxu1 }
  0xde   : > { %v627_v18 = vpop.f32.mrf.mxu1 }
  0xe0   : > { %v1615_v36 = vpop.f32.mrf.mxu0 }
  0xe1   : > { %v1629_v20 = vpop.f32.mrf.mxu1  ;;  %v633_v28 = vadd.f32 %v1625_v14, %v1615_v36 }
  0xe2   : > { %v519_v17 = vpop.f32.mrf.mxu0 }
  0xe3   : > { %v640_v22 = vpop.f32.mrf.mxu1  ;;  %v625_v31 = vadd.f32 %v624_v15, %v519_v17 }
  0xe4   : > { %v1616_v19 = vpop.f32.mrf.mxu0 }
  0xe5   : > { %v1630_v25 = vpop.f32.mrf.mxu1  ;;  %v636_v34 = vadd.f32 %v1626_v16, %v1616_v19 }
  0xe6   : > { %v522_v21 = vpop.f32.mrf.mxu0 }
  0xe7   : > { %v643_v29 = vpop.f32.mrf.mxu1  ;;  %v628_v39 = vadd.f32 %v627_v18, %v522_v21 }
  0xea   : > { %v1619_v23 = vpop.f32.mrf.mxu0 }
  0xeb   : > { %v649_v49 = vadd.f32 %v1629_v20, %v1619_v23 }
  0xec   : > { %v535_v24 = vpop.f32.mrf.mxu0 }
  0xed   : > { %v641_v53 = vadd.f32 %v640_v22, %v535_v24 }
  0xee   : > { %v1620_v26 = vpop.f32.mrf.mxu0 }
  0xef   : > { %v652_v60 = vadd.f32 %v1630_v25, %v1620_v26 }
  0xf0   : > { %v538_v27 = vpop.f32.mrf.mxu0 }
  0xf1   : > { %v644_v1 = vadd.f32 %v643_v29, %v538_v27 }
  0xf2   : > { %v1635_v30 = vpop.f32.mrf.mxu0 }
  0xf3   : > { %v774_v32 = vadd.f32 %v1635_v30, %v633_v28 }
  0xf4   : > { %v741_v33 = vpop.f32.mrf.mxu0 }
  0xf5   : > { %v772_v6 = vadd.f32 %v741_v33, %v625_v31  ;;  %v1645_v35 = vpop.f32.mrf.mxu1 }
  0xf6   : > { %v1636_v38 = vpop.f32.mrf.mxu0  ;;  %v1010_v40 = vadd.f32 %v1645_v35, %v774_v32 }
  0xf7   : > { %v775_v41 = vadd.f32 %v1636_v38, %v636_v34  ;;  %v977_v42 = vpop.f32.mrf.mxu1 }
  0xf8   : > { %v744_v43 = vpop.f32.mrf.mxu0  ;;  %v2000_v44 = vadd.f32 %v1550_v37, %v1010_v40  ;;  %v1008_v45 = vadd.f32 %v977_v42, %v772_v6 }
  0xf9   : > { %v773_v46 = vadd.f32 %v744_v43, %v628_v39  ;;  %v1646_v47 = vpop.f32.mrf.mxu1 }
  0xfa   : > { %v1639_v48 = vpop.f32.mrf.mxu0  ;;  %v1553_v50 = vmul.f32 -1.442695, %v2000_v44  ;;  %v2003_v51 = vadd.f32 %v1550_v37, %v1008_v45  ;;  %v1011_v52 = vadd.f32 %v1646_v47, %v775_v41 }
  0xfb   : > { %v980_v54 = vpop.f32.mrf.mxu1  ;;  %v778_v59 = vadd.f32 %v1639_v48, %v649_v49 }
  0xfc   : > { %v757_v55 = vpop.f32.mrf.mxu0  ;;  %v1551_v56 = vmul.f32 -1.442695, %v2003_v51  ;;  %v2006_v57 = vadd.f32 %v1550_v37, %v1011_v52  ;;  %v1009_v58 = vadd.f32 %v980_v54, %v773_v46  ;;  %1721 = vpow2.f32 %v1553_v50 }
  0xfd   : > { %v776_v0 = vadd.f32 %v757_v55, %v641_v53 }
  0xfe   : > { %v1640_v61 = vpop.f32.mrf.mxu0  ;;  %1723 = vpow2.f32 %v1551_v56  ;;  %v1554_v62 = vmul.f32 -1.442695, %v2006_v57  ;;  %v1024_v63 = vadd.f32 %v1550_v37, %v1009_v58 }
  0xff   : > { %v1649_v2 = vpop.f32.mrf.mxu1  ;;  %v779_v7 = vadd.f32 %v1640_v61, %v652_v60  ;;  %v1709_v60 = vld [vmem:[%s2075_s5 + $0x30] ss:$8 sps:$4 sm:$0xff]   ;;  %v1714_v61 = vld [vmem:[%s2075_s5 + $0x24] ss:$8 sps:$4 sm:$0xff]  }
 0x100   : > { %v760_v3 = vpop.f32.mrf.mxu0  ;;  %1725 = vpow2.f32 %v1554_v62  ;;  %v1552_v4 = vmul.f32 -1.442695, %v1024_v63  ;;  %v1014_v5 = vadd.f32 %v1649_v2, %v778_v59  ;;  %v1711_v59 = vld [vmem:[%s2075_s5 + $0x34] ss:$8 sps:$4 sm:$0xff]   ;;  %v1712_v62 = vld [vmem:[%s2075_s5 + $0x20] ss:$8 sps:$4 sm:$0xff]  }
 0x101   : > { %v993_v8 = vpop.f32.mrf.mxu1  ;;  %v777_v11 = vadd.f32 %v760_v3, %v644_v1  ;;  %1351 = vmatprep.subr.bf16.mxu1 %v1711_v59  ;;  %v1715_v1 = vld [vmem:[%s2075_s5 + $0x10] ss:$8 sps:$4 sm:$0xff]   ;;  %v1720_v2 = vld [vmem:[%s2075_s5 + $0x4] ss:$8 sps:$4 sm:$0xff]   ;;  %v1718_v3 = vld [vmem:[%s2075_s5] ss:$8 sps:$4 sm:$0xff]  }
 0x102   : > { %1727 = vpow2.f32 %v1552_v4  ;;  %v1029_v9 = vadd.f32 %v1550_v37, %v1014_v5  ;;  %v1012_v10 = vadd.f32 %v993_v8, %v776_v0  ;;  %1352 = vmatpush1.bf16.msra.mxu1 %v1709_v60  ;;  %v1810_v0 = vmov 0   ;;  %v1559_v4 = vld [vmem:[%s2074_s4] ss:$0 sm:$0xff] }
 0x103   : > { %v1650_v12 = vpop.f32.mrf.mxu1  ;;  %1353 = vmatprep.subr.bf16.mxu1 %v1714_v61  ;;  %1375 = vmatprep.mubr.bf16.mxu1 %v1810_v0 }
 0x104   : > { %v1557_v13 = vmul.f32 -1.442695, %v1029_v9  ;;  %v1027_v14 = vadd.f32 %v1550_v37, %v1012_v10  ;;  %v1015_v15 = vadd.f32 %v1650_v12, %v779_v7 }
 0x105   : > { %v996_v16 = vpop.f32.mrf.mxu1 }
 0x106   : > { %v1555_v36 = vmul.f32 -1.442695, %v1027_v14  ;;  %v1030_v17 = vadd.f32 %v1550_v37, %v1015_v15  ;;  %v1013_v18 = vadd.f32 %v996_v16, %v777_v11  ;;  %1729 = vpow2.f32 %v1557_v13  ;;  %1354 = vmatpush1.bf16.msra.mxu1 %v1712_v62 }
 0x108   : > { %1731 = vpow2.f32 %v1555_v36  ;;  %v1558_v19 = vmul.f32 -1.442695, %v1030_v17  ;;  %v1028_v20 = vadd.f32 %v1550_v37, %v1013_v18 }
 0x109   : > { %v1722_v21 = vpop.eup %1721 }
 0x10a   : > { %1733 = vpow2.f32 %v1558_v19  ;;  %v1556_v22 = vmul.f32 -1.442695, %v1028_v20  ;;  %v1057_v26 = vadd.f32 1.0, %v1722_v21 }
 0x10b   : > { %v1724_v23 = vpop.eup %1723 }
 0x10c   : > { %v1055_v24 = vadd.f32 1.0, %v1724_v23  ;;  %1735 = vpow2.f32 %v1556_v22 }
 0x10d   : > { %v1726_v25 = vpop.eup %1725 }
 0x10e   : > { %v1058_v27 = vadd.f32 1.0, %v1726_v25  ;;  %1737 = vrcp.f32 %v1055_v24 }
 0x10f   : > { %v1728_v28 = vpop.eup %1727 }
 0x110   : > { %1739 = vrcp.f32 %v1058_v27  ;;  %v1056_v29 = vadd.f32 1.0, %v1728_v28 }
 0x111   : > { %1741 = vrcp.f32 %v1057_v26 }
 0x112   : > { %1743 = vrcp.f32 %v1056_v29 }
 0x113   : > { %v1730_v30 = vpop.eup %1729 }
 0x114   : > { %v1061_v34 = vadd.f32 1.0, %v1730_v30 }
 0x115   : > { %v1732_v31 = vpop.eup %1731 }
 0x116   : > { %v1059_v33 = vadd.f32 1.0, %v1732_v31 }
 0x117   : > { %v1734_v32 = vpop.eup %1733 }
 0x118   : > { %v1062_v6 = vadd.f32 1.0, %v1734_v32 }
 0x119   : > { %v1736_v35 = vpop.eup %1735 }
 0x11a   : > { %1745 = vrcp.f32 %v1062_v6  ;;  %v1060_v37 = vadd.f32 1.0, %v1736_v35 }
 0x11b   : > { %1747 = vrcp.f32 %v1059_v33  ;;  %v1738_v38 = vpop.eup %1737 }
 0x11c   : > { %1749 = vrcp.f32 %v1061_v34  ;;  %v1079_v43 = vmul.f32 %v1738_v38, %v2003_v51 }
 0x11d   : > { %v1740_v39 = vpop.eup %1739  ;;  %1751 = vrcp.f32 %v1060_v37 }
 0x11e   : > { %v1742_v40 = vpop.eup %1741  ;;  %v1082_v42 = vmul.f32 %v1740_v39, %v2006_v57 }
 0x11f   : > { %v1744_v41 = vpop.eup %1743  ;;  %v1081_v46 = vmul.f32 %v1742_v40, %v2000_v44  ;;  %v1809_v44 = vmov 0.0  }
 0x120   : > { %v1080_v45 = vmul.f32 %v1744_v41, %v1024_v63  ;;  %314 = vst.msk [vmem:[#allocation2] sm:$0x1] %vm313_vm6, %v1809_v44  ;;  %v1717_v63 = vld [vmem:[%s2075_s5 + $0x14] ss:$8 sps:$4 sm:$0xff]  }
 0x121   : > { %v1088_v48 = vpack.c.bf16 %v1082_v42, %v1081_v46  ;;  %1355 = vmatprep.subr.bf16.mxu1 %v1717_v63 }
 0x122   : > { %v1087_v47 = vpack.c.bf16 %v1080_v45, %v1079_v43  ;;  %1356 = vmatpush1.bf16.msra.mxu1 %v1715_v1 }
 0x123   : > { %1357 = vmatprep.subr.bf16.mxu1 %v1720_v2 }
 0x124   : > { %1655 = vmatprep.mubr.msk.bf16.mxu0 %vm1114_vm5, %v1087_v47 }
 0x125   : > { %1656 = vmatmul.mubr.msk.bf16.vlgmr.msra.gmra.mxu0 %vm1114_vm5, %v1088_v48 }
 0x126   : > { %1358 = vmatpush1.bf16.msra.mxu1 %v1718_v3 }
 0x127   : > { %v1746_v49 = vpop.eup %1745 }
 0x128   : > { %v1748_v50 = vpop.eup %1747  ;;  %v1086_v54 = vmul.f32 %v1746_v49, %v1030_v17 }
 0x129   : > { %v1750_v52 = vpop.eup %1749  ;;  %v1083_v55 = vmul.f32 %v1748_v50, %v1027_v14 }
 0x12a   : > { %v1752_v53 = vpop.eup %1751  ;;  %v1085_v57 = vmul.f32 %v1750_v52, %v1029_v9 }
 0x12b   : > { %v1084_v56 = vmul.f32 %v1752_v53, %v1028_v20 }
 0x12c   : > { %v1090_v51 = vpack.c.bf16 %v1086_v54, %v1085_v57 }
 0x12d   : > { %v1089_v58 = vpack.c.bf16 %v1084_v56, %v1083_v55 }
 0x12f   : > { %1659 = vmatprep.mubr.msk.bf16.mxu0 %vm1114_vm5, %v1089_v58 }
 0x130   : > { %1660 = vmatmul.mubr.msk.bf16.gmra.mxu0 %vm1114_vm5, %v1090_v51 }
 0x1e5   : > { %v1657_v5 = vpop.f32.mrf.mxu0 }
 0x1e6   : > { %v1170_v7 = vadd.f32 %v1657_v5, %v1559_v4 }
 0x1e7   : > { %v1161_v8 = vpop.f32.mrf.mxu0 }
 0x1e8   : > { %v1568_v9 = vmul.f32 -1.442695, %v1170_v7  ;;  %v1162_v10 = vadd.f32 %v1559_v4, %v1161_v8 }
 0x1e9   : > { %v1658_v11 = vpop.f32.mrf.mxu0 }
 0x1ea   : > { %1753 = vpow2.f32 %v1568_v9  ;;  %v1566_v12 = vmul.f32 -1.442695, %v1162_v10  ;;  %v1173_v13 = vadd.f32 %v1658_v11, %v1559_v4 }
 0x1eb   : > { %v1164_v14 = vpop.f32.mrf.mxu0 }
 0x1ec   : > { %1755 = vpow2.f32 %v1566_v12  ;;  %v1569_v15 = vmul.f32 -1.442695, %v1173_v13  ;;  %v1165_v16 = vadd.f32 %v1559_v4, %v1164_v14 }
 0x1ee   : > { %1757 = vpow2.f32 %v1569_v15  ;;  %v1567_v36 = vmul.f32 -1.442695, %v1165_v16 }
 0x1f0   : > { %1759 = vpow2.f32 %v1567_v36  ;;  %v1661_v17 = vpop.f32.mrf.mxu0 }
 0x1f1   : > { %v1186_v18 = vadd.f32 %v1661_v17, %v1559_v4  ;;  %v1248_v17 = vld [vmem:[#allocation2] sm:$0x1] }
 0x1f2   : > { %v1177_v19 = vpop.f32.mrf.mxu0 }
 0x1f3   : > { %v1572_v20 = vmul.f32 -1.442695, %v1186_v18  ;;  %v1178_v21 = vadd.f32 %v1559_v4, %v1177_v19 }
 0x1f4   : > { %v1662_v22 = vpop.f32.mrf.mxu0 }
 0x1f5   : > { %1761 = vpow2.f32 %v1572_v20  ;;  %v1570_v23 = vmul.f32 -1.442695, %v1178_v21  ;;  %v1189_v24 = vadd.f32 %v1662_v22, %v1559_v4 }
 0x1f6   : > { %v1180_v25 = vpop.f32.mrf.mxu0 }
 0x1f7   : > { %v1754_v26 = vpop.eup %1753  ;;  %1763 = vpow2.f32 %v1570_v23  ;;  %v1573_v27 = vmul.f32 -1.442695, %v1189_v24  ;;  %v1181_v28 = vadd.f32 %v1559_v4, %v1180_v25  ;;  %v1330_v23 = vlaneseq }
 0x1f8   : > { %v1218_v31 = vadd.f32 1.0, %v1754_v26 }
 0x1f9   : > { %v1756_v29 = vpop.eup %1755  ;;  %1765 = vpow2.f32 %v1573_v27  ;;  %v1571_v30 = vmul.f32 -1.442695, %v1181_v28  ;;  %v1811_v27 = vmov 1966171168   ;;  %vm1404_vm8 = vcmp.lt.s32.totalorder %v1330_v23, 256 }
 0x1fa   : > { %v1216_v32 = vadd.f32 1.0, %v1756_v29  ;;  %v1288_v29 = vld [vmem:[%s2076_s6] sm:$0x3] }
 0x1fb   : > { %v1758_v33 = vpop.eup %1757  ;;  %1767 = vpow2.f32 %v1571_v30 }
 0x1fc   : > { %1769 = vrcp.f32 %v1216_v32  ;;  %v1219_v34 = vadd.f32 1.0, %v1758_v33 }
 0x1fd   : > { %v1760_v6 = vpop.eup %1759  ;;  %1771 = vrcp.f32 %v1218_v31 }
 0x1fe   : > { %v1217_v35 = vadd.f32 1.0, %v1760_v6  ;;  %1773 = vrcp.f32 %v1219_v34 }
 0x200   : > { %1775 = vrcp.f32 %v1217_v35 }
 0x202   : > { %v1762_v37 = vpop.eup %1761 }
 0x203   : > { %v1222_v39 = vadd.f32 1.0, %v1762_v37 }
 0x204   : > { %v1764_v38 = vpop.eup %1763 }
 0x205   : > { %v1220_v40 = vadd.f32 1.0, %v1764_v38 }
 0x206   : > { %v1766_v41 = vpop.eup %1765 }
 0x207   : > { %1777 = vrcp.f32 %v1220_v40  ;;  %v1223_v42 = vadd.f32 1.0, %v1766_v41 }
 0x208   : > { %v1768_v43 = vpop.eup %1767  ;;  %1779 = vrcp.f32 %v1222_v39 }
 0x209   : > { %v1770_v45 = vpop.eup %1769  ;;  %v1221_v46 = vadd.f32 1.0, %v1768_v43  ;;  %1781 = vrcp.f32 %v1223_v42 }
 0x20a   : > { %v1772_v47 = vpop.eup %1771  ;;  %v1240_v49 = vmul.f32 %v1770_v45, %v1162_v10 }
 0x20b   : > { %1783 = vrcp.f32 %v1221_v46  ;;  %v1774_v48 = vpop.eup %1773  ;;  %v1242_v52 = vmul.f32 %v1772_v47, %v1170_v7 }
 0x20c   : > { %v1250_v54 = vsel %vm1249_vm7, %v1240_v49, 0.0  ;;  %v1243_v55 = vmul.f32 %v1774_v48, %v1173_v13 }
 0x20d   : > { %v1776_v50 = vpop.eup %1775  ;;  %v1253_v58 = vsel %vm1249_vm7, %v1242_v52, 0.0 }
 0x20e   : > { %v1241_v53 = vmul.f32 %v1776_v50, %v1165_v16  ;;  %v1255_v59 = vsel %vm1249_vm7, %v1243_v55, 0.0 }
 0x210   : > { %v1251_v56 = vsel %vm1249_vm7, %v1241_v53, 0.0 }
 0x211   : > { %v1252_v57 = vadd.f32 %v1251_v56, %v1250_v54 }
 0x213   : > { %v1254_v51 = vadd.f32 %v1253_v58, %v1252_v57 }
 0x214   : > { %v1778_v44 = vpop.eup %1777 }
 0x215   : > { %v1244_v60 = vmul.f32 %v1778_v44, %v1178_v21  ;;  %v1256_v61 = vadd.f32 %v1255_v59, %v1254_v51  ;;  %v1780_v62 = vpop.eup %1779 }
 0x216   : > { %v1782_v63 = vpop.eup %1781  ;;  %v1246_v3 = vmul.f32 %v1780_v62, %v1186_v18 }
 0x217   : > { %v1257_v0 = vsel %vm1249_vm7, %v1244_v60, 0.0  ;;  %v1247_v5 = vmul.f32 %v1782_v63, %v1189_v24  ;;  %v1331_v24 = vshrl.u32 %v1330_v23, 7 }
 0x218   : > { %v1784_v1 = vpop.eup %1783  ;;  %v1258_v2 = vadd.f32 %v1257_v0, %v1256_v61  ;;  %v1261_v9 = vsel %vm1249_vm7, %v1246_v3, 0.0 }
 0x219   : > { %v1245_v4 = vmul.f32 %v1784_v1, %v1181_v28  ;;  %v1263_v11 = vsel %vm1249_vm7, %v1247_v5, 0.0  ;;  %v1332_v25 = vsub.s32 0, %v1331_v24  ;;  %v1336_v26 = vsub.s32 1, %v1331_v24 }
 0x21a   : > { %v1388_v28 = vunpack.c.l.s4 %v1811_v27 }
 0x21b   : > { %v1259_v7 = vsel %vm1249_vm7, %v1245_v4, 0.0  ;;  %v1333_v30 = vrot.slane %v1288_v29, %v1332_v25  ;;  %v1337_v31 = vrot.slane %v1288_v29, %v1336_v26 }
 0x21c   : > { %v1260_v8 = vadd.f32 %v1259_v7, %v1258_v2  ;;  %v1389_v32 = vunpack.c.0.s8 %v1388_v28 }
 0x21e   : > { %v1262_v10 = vadd.f32 %v1261_v9, %v1260_v8  ;;  %v1392_v37 = vsub.s32 %v1389_v32, %v1331_v24 }
 0x220   : > { %v1264_v12 = vadd.f32 %v1263_v11, %v1262_v10 }
 0x222   : > { %v1265_v13 = vrot.slane %v1264_v12, 4 }
 0x224   : > { %v1266_v14 = vadd.f32 %v1265_v13, %v1264_v12 }
 0x226   : > { %v1267_v15 = vrot.slane %v1266_v14, 2 }
 0x228   : > { %v1268_v16 = vadd.f32 %v1267_v15, %v1266_v14 }
 0x22a   : > { %v1269_v36 = vrot.slane %v1268_v16, 1 }
 0x22c   : > { %v1270_v19 = vadd.f32 %v1269_v36, %v1268_v16 }
 0x22e   : > { %v1271_v20 = vadd.f32 %v1270_v19, %v1248_v17 }
 0x230   : > { %1273 = vst.msk [vmem:[#allocation2] sm:$0x1] %vm313_vm6, %v1271_v20 }
 0x237   : > { %v1277_v18 = vld [vmem:[#allocation2] sm:$0x1] }
 0x238   : > { %v1278_v21 = vmul.f32 0.015625, %v1277_v18 }
 0x23a   : > { %v1279_v22 = vpack.c.bf16 %v1278_v21, %v1278_v21 }
 0x23c   : > { %1582 = vmatmul.mubr.msk.bf16.vlgmr.msra.gmra.mxu1 %vm1249_vm7, %v1279_v22 }
 0x2fc   : > { %v1377_v33 = vpop.f32.mrf.mxu1 }
 0x2fd   : > { %v1378_v6 = vadd.f32 %v1377_v33, %v1333_v30 }
 0x2fe   : > { %v1379_v34 = vpop.f32.mrf.mxu1 }
 0x2ff   : > { %v1380_v35 = vadd.f32 %v1379_v34, %v1337_v31 }
 0x300   : > { %v1381_v38 = vpop.f32.mrf.mxu1 }
 0x301   : > { %v1386_v39 = vcombine.low %v1378_v6, %v1380_v35 }
 0x302   : > { %v1382_v40 = vpop.f32.mrf.mxu1 }
 0x303   : > { %v1393_v41 = vrot.slane %v1386_v39, %v1392_v37 }
 0x305   : > { %v1400_v42 = vrot.slane %v1393_v41, %v1392_v37 }
 0x307   : > { %1406 = vst.msk [vmem:[%s307_s8] sm:$0x3] %vm1404_vm8, %v1400_v42 }
 0x308 PF: > { %s17_s26 = sadd.s32 1, %s1807_s26   ;;  %s2080_s24 = smov %s1803_s25 }
 0x309   : > { %p14_p5 = scmp.ge.s32.totalorder %s17_s26, 4   ;;  %s2081_s25 = smov %s2083_s27 }
 0x30b   :  { %16 = sbr.rel (!%p14_p5) target bundleno = 2 (0x2), region = 90 }

</bundles_post_ra>
